<compile_context>
chip_gen: v5e
topology: v5e:2x2
jax: 0.10.0
libtpu: 0.0.40
codegen_flags: <defaults>
</compile_context>

<pallas_src>
import math

import jax
import jax.numpy as jnp
from jax.experimental import pallas as pl
from jax.experimental.pallas import tpu as pltpu


def calculate_init(num_res_layers, output_change_scale="O(logn)") -> float:
    if output_change_scale in ("O(logn)", "default"):
        omega_value = (num_res_layers + 1) / math.log(num_res_layers + 1) - 1
    elif output_change_scale == "O(n)":
        omega_value = 1.0
    else:
        assert output_change_scale == "O(1)", (
            "only O(n), O(logn), and O(1) output changes are supported."
        )
        omega_value = num_res_layers
    return omega_value ** 0.5


def _cdiv(a, b):
    return -(-a // b)


def _omega_residual_kernel(x_ref, fx_ref, omega_ref, o_ref):
    # x_ref, fx_ref, o_ref: (TILE_R, D_eff) VMEM tiles; omega_ref: (1, D_eff)
    # f32, resident across the whole grid (constant index_map). Compute in f32
    # (single rounding for low-precision activations), cast once at the store.
    x = x_ref[...].astype(jnp.float32)
    fx = fx_ref[...].astype(jnp.float32)
    o_ref[...] = (x * omega_ref[...] + fx).astype(o_ref.dtype)


def _vmem_limit_and_budget():
    # Per-generation budgets:
    #   v5e/v6e: 128 MiB physical VMEM -> 64 MiB limit, 48 MiB sizing budget
    #   v7x    :  64 MiB physical VMEM -> 32 MiB limit, 24 MiB sizing budget
    try:
        cap = int(pltpu.get_tpu_info().vmem_capacity_bytes)
    except Exception:
        cap = 64 * 1024 * 1024  # conservative (v7x per-TensorCore)
    limit = min(cap // 2, 64 * 1024 * 1024)
    budget = (limit * 3) // 4  # headroom for omega / metadata / scheduling
    return limit, budget


def _choose_tile_r(r_eff, d_eff, itemsize, sublane, budget_bytes):
    """Rows per block: as large as the VMEM budget allows (3 streams x 2
    pipeline buffers), sublane-aligned, with >= 2 grid steps when the problem
    is big enough so both v7x TensorCores get work."""
    row_bytes = d_eff * itemsize
    rows = budget_bytes // (3 * 2 * row_bytes)
    rows = max(sublane, (rows // sublane) * sublane)
    if rows >= r_eff:
        if r_eff >= 4 * sublane:
            # Everything fits in one block: split into 2 so a v7x chip can
            # shard the "parallel" row axis across its two TensorCores.
            half = _cdiv(r_eff, 2)
            rows = _cdiv(half, sublane) * sublane
        else:
            rows = r_eff  # tiny: one full-extent block (allowed by Mosaic)
    return rows


def omega_residual(x, f_x, omega, *, donate_f_x=False, force_pallas=False):
    """Compute x * omega + f_x with a Pallas TPU kernel.

    x, f_x: (..., D) arrays of identical shape/dtype.
    omega:  (D,) per-embed-dim rescalar.
    donate_f_x: alias the f_x input buffer to the output (only if the caller
                no longer needs f_x).
    force_pallas: bypass the small-problem plain-JAX fallback (for testing).
    """
    assert x.shape == f_x.shape, "x and f_x must have the same shape"
    assert x.dtype == f_x.dtype, "x and f_x must have the same dtype"
    D = x.shape[-1]
    assert omega.shape == (D,), "omega must be an (embed_dim,) vector"

    orig_shape = x.shape
    R = math.prod(orig_shape[:-1])  # static python int; jit-safe
    dtype = x.dtype
    itemsize = jnp.dtype(dtype).itemsize

    def _jax_fallback():
        return (x.astype(jnp.float32) * omega.astype(jnp.float32)
                + f_x.astype(jnp.float32)).astype(dtype)

    # Small-problem fallback: pallas_call launch + per-step fixed overhead
    # dominates tiny shapes; XLA already fuses this FMA at HBM roofline.
    if not force_pallas and R * D * itemsize < (1 << 20):
        return _jax_fallback()

    # Lane-dense repack when D is not a multiple of 128 lanes:
    # (R, D) -> (R/k, k*D) with omega tiled k times. A contiguous row-major
    # reshape is free; semantics are unchanged.
    D_eff, R_eff, k = D, R, 1
    if D % 128 != 0:
        k = 128 // math.gcd(D, 128)
        if R % k != 0:
            # TODO(synk): handle the ragged R % k remainder with an in-kernel
            # tail block; for now XLA's fused FMA is already at HBM roofline.
            return _jax_fallback()
        D_eff = D * k
        R_eff = R // k

    x2 = x.reshape(R_eff, D_eff)
    fx2 = f_x.reshape(R_eff, D_eff)
    om = omega.astype(jnp.float32)
    if k > 1:
        om = jnp.tile(om, k)
    om2 = om.reshape(1, D_eff)

    sublane = max(8, 32 // itemsize)  # 8 for f32, 16 for bf16, 32 for 8-bit
    vmem_limit, budget = _vmem_limit_and_budget()
    tile_r = _choose_tile_r(R_eff, D_eff, itemsize, sublane, budget)

    # No padding: the last (possibly partial) block is clipped by Pallas.
    grid = (_cdiv(R_eff, tile_r),)

    # Robustness for very wide D_eff: make sure the limit covers this tiling.
    needed = 3 * 2 * tile_r * D_eff * itemsize + 2 * D_eff * 4 + (1 << 20)
    vmem_limit = int(max(vmem_limit, needed))

    extra_kwargs = {}
    if donate_f_x:
        # f_x is input index 1 of the call below; no wrapper copies exist any
        # more, so the alias actually targets the caller's buffer.
        extra_kwargs["input_output_aliases"] = {1: 0}

    out = pl.pallas_call(
        _omega_residual_kernel,
        out_shape=jax.ShapeDtypeStruct((R_eff, D_eff), dtype),
        grid_spec=pltpu.PrefetchScalarGridSpec(
            num_scalar_prefetch=0,
            grid=grid,
            in_specs=[
                pl.BlockSpec((tile_r, D_eff), lambda i: (i, 0)),  # x
                pl.BlockSpec((tile_r, D_eff), lambda i: (i, 0)),  # f_x
                pl.BlockSpec((1, D_eff), lambda i: (0, 0)),       # omega (resident)
            ],
            out_specs=pl.BlockSpec((tile_r, D_eff), lambda i: (i, 0)),
        ),
        compiler_params=pltpu.CompilerParams(
            dimension_semantics=("parallel",),        # disjoint output blocks
            vmem_limit_bytes=vmem_limit,
        ),
        cost_estimate=pl.CostEstimate(
            flops=2 * R_eff * D_eff,
            transcendentals=0,
            bytes_accessed=3 * R_eff * D_eff * itemsize + D_eff * 4,
        ),
        **extra_kwargs,
    )(x2, fx2, om2)

    return out.reshape(orig_shape)


class OmegaResidual:
    """Minimal JAX analogue of admin_torch's OmegaResidual (forward only)."""

    def __init__(self, init_value, as_parameter=False, embed_dim=None,
                 dtype=jnp.float32):
        if as_parameter:
            assert embed_dim is not None, (
                "embed_dim is required when as_parameter is set as True"
            )
            self.omega = jnp.full((embed_dim,), init_value, dtype=dtype)
            self._plain_add = False
        else:
            # buffer case; init_value == 1.0 degenerates to ordinary residual
            self.omega = jnp.asarray([init_value], dtype=dtype)
            self._plain_add = (init_value == 1.0)
        self._embed_dim = embed_dim

    def __call__(self, x, f_x):
        if self._plain_add:
            return x + f_x  # forward_original
        omega = self.omega
        if omega.shape[0] != x.shape[-1]:
            # scalar-buffer case: broadcast the scalar across the embed dim
            omega = jnp.broadcast_to(omega, (x.shape[-1],))
        return omega_residual(x, f_x, omega)


if __name__ == "__main__":
    # Small shapes implied by the module: (batch, seq, embed_dim)
    batch, seq, embed_dim = 2, 8, 32
    num_res_layers = 12  # e.g. a 6-layer encoder -> 2*6 residual layers
    init_value = calculate_init(num_res_layers, "O(logn)")

    key = jax.random.PRNGKey(0)
    kx, kf, kx2, kf2, kx3, kf3 = jax.random.split(key, 6)

    # (1) as_parameter path at the module's small shape; force the Pallas
    # kernel so it is actually compiled/run (exercises the lane-dense repack:
    # D=32 -> D_eff=128).
    x = jax.random.normal(kx, (batch, seq, embed_dim), dtype=jnp.float32)
    f_x = jax.random.normal(kf, (batch, seq, embed_dim), dtype=jnp.float32)
    module = OmegaResidual(init_value, as_parameter=True, embed_dim=embed_dim)
    out = jax.block_until_ready(
        omega_residual(x, f_x, module.omega, force_pallas=True))
    ref = x * module.omega + f_x
    assert out.shape == x.shape
    assert jnp.allclose(out, ref, atol=1e-6, rtol=1e-6), "mismatch (repack path)"

    # (2) multi-step grid with a clipped partial last block (D multiple of 128).
    x2 = jax.random.normal(kx2, (3, 100, 256), dtype=jnp.float32)
    f2 = jax.random.normal(kf2, (3, 100, 256), dtype=jnp.float32)
    om_b = jnp.full((256,), init_value, dtype=jnp.float32)
    out2 = jax.block_until_ready(omega_residual(x2, f2, om_b, force_pallas=True))
    assert jnp.allclose(out2, x2 * om_b + f2, atol=1e-6, rtol=1e-6), \
        "mismatch (partial-block path)"

    # (3) bf16 inputs (f32 compute in-kernel, bf16 store).
    x3 = jax.random.normal(kx3, (2, 24, 128), dtype=jnp.bfloat16)
    f3 = jax.random.normal(kf3, (2, 24, 128), dtype=jnp.bfloat16)
    om_c = jnp.full((128,), init_value, dtype=jnp.float32)
    out3 = jax.block_until_ready(omega_residual(x3, f3, om_c, force_pallas=True))
    ref3 = (x3.astype(jnp.float32) * om_c
            + f3.astype(jnp.float32)).astype(jnp.bfloat16)
    assert jnp.allclose(out3.astype(jnp.float32), ref3.astype(jnp.float32),
                        atol=2e-2, rtol=2e-2), "mismatch (bf16 path)"

    # (4) module-level paths: small-size fallback, ragged-repack fallback, and
    # the ordinary-residual (buffer, init=1.0) path.
    out_mod = jax.block_until_ready(module(x, f_x))
    assert jnp.allclose(out_mod, ref, atol=1e-6, rtol=1e-6)
    x4 = jax.random.normal(kx, (1, 17, 32), dtype=jnp.float32)   # R % k != 0
    f4 = jax.random.normal(kf, (1, 17, 32), dtype=jnp.float32)
    assert jnp.allclose(module(x4, f4), x4 * module.omega + f4,
                        atol=1e-6, rtol=1e-6)
    plain = OmegaResidual(1.0, as_parameter=False)
    assert jnp.allclose(plain(x, f_x), x + f_x, atol=1e-6, rtol=1e-6)

    print("KERNEL_OK")
</pallas_src>

<mosaic_0001>
module attributes {stable_mosaic.version = 11 : i64} {
  func.func @_omega_residual_kernel(%arg0: i32, %arg1: memref<4x128xf32, #tpu.memory_space<vmem>>, %arg2: memref<4x128xf32, #tpu.memory_space<vmem>>, %arg3: memref<1x128xf32, #tpu.memory_space<vmem>>, %arg4: memref<4x128xf32, #tpu.memory_space<vmem>>) attributes {dimension_semantics = [#tpu.dimension_semantics<parallel>], iteration_bounds = array<i64: 1>, scalar_prefetch = 0 : i64, scratch_operands = 0 : i64, tpu.core_type = #tpu.core_type<tc>, window_params = [{transform_indices = @transform_0, window_bounds = array<i64: 4, 128>}, {transform_indices = @transform_1, window_bounds = array<i64: 4, 128>}, {pipeline_mode = #tpu.pipeline_mode<synchronous>, transform_indices = @transform_2, window_bounds = array<i64: 1, 128>}, {transform_indices = @transform_3, window_bounds = array<i64: 4, 128>}]} {
    %c0 = arith.constant 0 : index
    %c0_0 = arith.constant 0 : index
    %0 = vector.load %arg1[%c0, %c0_0] : memref<4x128xf32, #tpu.memory_space<vmem>>, vector<4x128xf32>
    %c0_1 = arith.constant 0 : index
    %c0_2 = arith.constant 0 : index
    %1 = vector.load %arg2[%c0_1, %c0_2] : memref<4x128xf32, #tpu.memory_space<vmem>>, vector<4x128xf32>
    %c0_3 = arith.constant 0 : index
    %c0_4 = arith.constant 0 : index
    %2 = vector.load %arg3[%c0_3, %c0_4] : memref<1x128xf32, #tpu.memory_space<vmem>>, vector<1x128xf32>
    %3 = vector.broadcast %2 : vector<1x128xf32> to vector<4x128xf32>
    %4 = arith.mulf %0, %3 : vector<4x128xf32>
    %5 = arith.addf %4, %1 : vector<4x128xf32>
    %c0_5 = arith.constant 0 : index
    %c0_6 = arith.constant 0 : index
    %6 = vector.load %arg4[%c0_5, %c0_6] : memref<4x128xf32, #tpu.memory_space<vmem>>, vector<4x128xf32>
    tpu.vector_store %arg4[%c0_5, %c0_6], %5 {strides = array<i32>} : memref<4x128xf32, #tpu.memory_space<vmem>>, vector<4x128xf32>,
    return
  }
  func.func @transform_0(%arg0: i32) -> (i32, i32) {
    %c0_i32 = arith.constant 0 : i32
    %c0_i32_0 = arith.constant 0 : i32
    return %arg0, %c0_i32 : i32, i32
  }
  func.func @transform_1(%arg0: i32) -> (i32, i32) {
    %c0_i32 = arith.constant 0 : i32
    %c0_i32_0 = arith.constant 0 : i32
    return %arg0, %c0_i32 : i32, i32
  }
  func.func @transform_2(%arg0: i32) -> (i32, i32) {
    %c0_i32 = arith.constant 0 : i32
    %c0_i32_0 = arith.constant 0 : i32
    %c0_i32_1 = arith.constant 0 : i32
    return %c0_i32, %c0_i32_0 : i32, i32
  }
  func.func @transform_3(%arg0: i32) -> (i32, i32) {
    %c0_i32 = arith.constant 0 : i32
    %c0_i32_0 = arith.constant 0 : i32
    return %arg0, %c0_i32 : i32, i32
  }
}

</mosaic_0001>

<bundles_post_ra>
// kernel: tpu_custom_call.1
= control target key start
LH: loop header
LB: loop body
LE: loop exit
PB: predicated region body
PF: predicated region fallthrough
CT: control target
= control target key end

     0   :  { %8 = vsyncpa [#allocation3], 0  ;;  %s187_s0 = inlined_call_operand.hbm [shape: f32[4,128], index: 0, kind: input, shape index: {}]   ;;  %s188_s1 = inlined_call_operand.hbm [shape: f32[4,128], index: 1, kind: input, shape index: {}]   ;;  %s189_s2 = inlined_call_operand.vmem [shape: f32[1,128], index: 2, kind: input, shape index: {}]   ;;  %s190_s3 = inlined_call_operand.hbm [shape: f32[4,128], index: 3, kind: output, shape index: {}]  }
   0x1   :  { %9 = vsyncpa [#allocation6], 0 }
   0x2   :  { %10 = vsyncpa [#allocation4], 0  ;;  %s16_s14 = sshll.u32 %s187_s0, 4  ;;  %s152_s15 = smov [#allocation2]   ;;  %s17_s14 = int_to_ptr.hbm [resolvable:$true] %s16_s14 }
   0x3   :  { %s18_s16 = sshll.u32 %s152_s15, 4  ;;  %s27_s19 = sshll.u32 %s188_s1, 4  ;;  %s19_s16 = int_to_ptr.vmem [resolvable:$true] %s18_s16  ;;  %s28_s19 = int_to_ptr.hbm [resolvable:$true] %s27_s19 }
   0x4   :  { %21 = dma.hbm_to_vmem [thread:$0]  %s17_s14, 64, %s19_s16, [#allocation3]  }
   0x5   :  { %s153_s20 = smov [#allocation5]  }
   0x6   :  { %s29_s21 = sshll.u32 %s153_s20, 4  ;;  %s30_s21 = int_to_ptr.vmem [resolvable:$true] %s29_s21 }
   0x7   :  { %32 = dma.hbm_to_vmem [thread:$0]  %s28_s19, 64, %s30_s21, [#allocation6]  }
   0x8   :  { %146 = dma.done.wait [#allocation3], 64  }
   0x9   :  { %147 = vsyncadd [#allocation3], 4294967232 }
   0xa   :  { %148 = dma.done.wait [#allocation6], 64  }
   0xb   :  { %149 = vsyncadd [#allocation6], 4294967232  ;;  %v43_v0 = vld [vmem:[#allocation2] sm:$0xf]  ;;  %v44_v2 = vld [vmem:[#allocation5] sm:$0xf] }
   0xc   :  { %v73_v1 = vld [vmem:[%s189_s2] ss:$0 sm:$0xff]  ;;  %s154_s23 = smov [#allocation7]   ;;  %s59_s26 = sshll.u32 %s190_s3, 4  ;;  %s60_s26 = int_to_ptr.hbm [resolvable:$true] %s59_s26 }
   0xd   :  { %s57_s24 = sshll.u32 %s154_s23, 4  ;;  %v49_v3 = vmul.f32 %v73_v1, %v43_v0  ;;  %s58_s24 = int_to_ptr.vmem [resolvable:$true] %s57_s24 }
   0xf   :  { %v50_v4 = vadd.f32 %v49_v3, %v44_v2 }
  0x11   :  { %51 = vst [vmem:[#allocation7] sm:$0xf] %v50_v4 }
  0x12   :  { %62 = dma.vmem_to_hbm [thread:$0]  %s58_s24, 64, %s60_s26, [#allocation4]  }
  0x13   :  { %150 = dma.done.wait [#allocation4], 64  }
  0x14   :  { %151 = vsyncadd [#allocation4], 4294967232 }
  0x15   :  { %67 = vsyncpa [#allocation3], 1 }
  0x16   :  { %68 = vsyncpa [#allocation6], 1 }
  0x17   :  { %69 = vsyncpa [#allocation4], 1 }

</bundles_post_ra>
